<compile_context>
chip_gen: v7x
topology: tpu7x:2x2x1
jax: 0.10.0
libtpu: 0.0.40
codegen_flags: <defaults>
</compile_context>

<pallas_src>
import functools

import numpy as np
import jax
import jax.numpy as jnp
from jax.experimental import pallas as pl
from jax.experimental.pallas import tpu as pltpu


_MIB = 1024 * 1024

# The one-hot MXU select was validated bit-exact for float32 (0/1 weights, f32
# accumulation) on current TPUs.  Flip this if a platform's default f32 matmul
# precision is ever reduced; float32 then routes through the exact gather path.
_ROUTE_F32_THROUGH_GATHER = False


# ---------------------------------------------------------------------------
# index normalization (mirrors the torch module __init__ semantics)
# ---------------------------------------------------------------------------
def _normalize_indices(indices, feature_dim):
    if isinstance(indices, int):
        indices = [indices]
    elif isinstance(indices, slice):
        start = 0 if indices.start is None else indices.start
        step = 1 if indices.step is None else indices.step
        indices = list(range(start, indices.stop, step))
    idx = np.asarray(indices, dtype=np.int64)
    idx = np.where(idx < 0, idx + feature_dim, idx).astype(np.int32)
    return idx


def _round_up(x, m):
    return ((x + m - 1) // m) * m


def _sublane(itemsize):
    # native sublane packing: 8 rows for 4-byte, 16 for 2-byte, 32 for 1-byte
    return max(8, 32 // max(1, itemsize))


def _vmem_budgets():
    """(scoped vmem limit, byte budget for all pipelined blocks) per generation."""
    phys = 64 * _MIB                      # conservative default (v7x per-core VMEM)
    try:
        phys = int(getattr(pltpu.get_tpu_info(), "vmem_capacity_bytes", phys)) or phys
    except Exception:
        pass
    limit = max(32 * _MIB, min(96 * _MIB, (phys * 3) // 4))
    block_budget = max(12 * _MIB, min(48 * _MIB, phys // 2 - 8 * _MIB))
    return limit, block_budget


def _clamp_tile_r(tr, rows, sub, cap):
    tr = max(sub, (int(tr) // sub) * sub)
    tr = min(tr, cap, _round_up(rows, sub))
    # Keep >= 2 row blocks so v7x's two TensorCores can split the parallel row
    # axis; harmless (one extra grid step) on single-core v5e/v6e.
    if rows >= 2 * sub:
        tr = min(tr, _round_up(pl.cdiv(rows, 2), sub))
    return max(sub, tr)


def _coalesce_runs(idx):
    # static tuple of (dst_start, src_start, length) over consecutive indices
    runs, t, k = [], 0, len(idx)
    while t < k:
        s = t
        while t + 1 < k and idx[t + 1] == idx[t] + 1:
            t += 1
        runs.append((s, int(idx[s]), t - s + 1))
        t += 1
    return tuple(runs)


def _mxu_tiles(k, cb, itemsize, budget, rows, sub):
    def tile_r_for(tk):
        fixed = 2 * cb * tk * itemsize                 # sel block (double-buffered)
        per_row = 2 * (cb + tk) * itemsize + 4 * tk    # x + out blocks (x2) + f32 acc
        return (budget - fixed) // per_row if budget > fixed else 0

    tile_k = k                                         # prefer sel fully resident
    tr = tile_r_for(tile_k)
    while tr < sub and tile_k > 256:                   # 256-wide K tiles if tiling
        tile_k = max(256, _round_up(tile_k // 2, 256))
        tr = tile_r_for(tile_k)
    tile_r = _clamp_tile_r(max(tr, sub), rows, sub, 2048)
    return tile_r, tile_k


# ---------------------------------------------------------------------------
# kernels
# ---------------------------------------------------------------------------
def _copy_block_kernel(x_ref, o_ref):
    o_ref[...] = x_ref[...]


def _slice_copy_kernel(x_ref, o_ref, *, start, k):
    o_ref[...] = x_ref[:, start:start + k]


def _run_gather_kernel(x_ref, o_ref, *, runs):
    # direct stores of coalesced runs -- no K-wide concatenate temp
    for dst, src, ln in runs:
        o_ref[:, dst:dst + ln] = x_ref[:, src:src + ln]


def _onehot_matmul_kernel(tbl_ref, x_ref, sel_ref, o_ref, acc_ref):
    # tbl_ref: (n_active,) SMEM   active feature-block table (used by index_maps)
    # x_ref:   (tile_r, cb)       one active feature block of x
    # sel_ref: (cb, tile_k)       static 0/1 selection slice for that block
    # o_ref:   (tile_r, tile_k)
    # acc_ref: (tile_r, tile_k)   f32 accumulator across the active blocks
    del tbl_ref
    c = pl.program_id(2)

    @pl.when(c == 0)
    def _():
        acc_ref[...] = jnp.zeros_like(acc_ref)

    acc_ref[...] += jnp.dot(x_ref[...], sel_ref[...],
                            preferred_element_type=jnp.float32)

    @pl.when(c == pl.num_programs(2) - 1)
    def _():
        o_ref[...] = acc_ref[...].astype(o_ref.dtype)


# ---------------------------------------------------------------------------
# wrapper
# ---------------------------------------------------------------------------
def select(x, indices):
    """Pallas equivalent of Select(indices)(x) == x[..., indices]."""
    *lead, feat = x.shape
    idx = _normalize_indices(indices, feat)
    k = int(idx.shape[0])

    rows = int(np.prod(lead)) if lead else 1
    x2 = x.reshape(rows, feat)
    itemsize = x.dtype.itemsize
    sub = _sublane(itemsize)
    vmem_limit, budget = _vmem_budgets()

    contiguous = bool(k > 0 and np.all(np.diff(idx) == 1))
    is_float = bool(jnp.issubdtype(x.dtype, jnp.floating))
    use_mxu_dtype = is_float and not (x.dtype == jnp.float32 and _ROUTE_F32_THROUGH_GATHER)
    start = int(idx[0]) if k > 0 else 0

    # 128-wide feature blocks touched by the index set (drives HBM traffic).
    cb = 128 if feat % 128 == 0 else feat
    active_blocks = np.unique(idx // cb)
    n_active = int(active_blocks.shape[0])

    def params_1d():
        return pltpu.CompilerParams(dimension_semantics=("parallel",),
                                    vmem_limit_bytes=vmem_limit)

    # --- path 1a: contiguous, 128-aligned window -> column-blocked copy -------
    def run_windowed_copy():
        tile_r = _clamp_tile_r(budget // (2 * (128 + 128) * itemsize), rows, sub, 4096)
        c0 = start // 128
        return pl.pallas_call(
            _copy_block_kernel,
            out_shape=jax.ShapeDtypeStruct((rows, k), x.dtype),
            grid_spec=pltpu.PrefetchScalarGridSpec(
                num_scalar_prefetch=0,
                grid=(pl.cdiv(rows, tile_r), pl.cdiv(k, 128)),
                in_specs=[pl.BlockSpec((tile_r, 128), lambda i, c: (i, c0 + c))],
                out_specs=pl.BlockSpec((tile_r, 128), lambda i, c: (i, c)),
            ),
            compiler_params=pltpu.CompilerParams(
                dimension_semantics=("parallel", "parallel"),
                vmem_limit_bytes=vmem_limit),
        )(x2)

    # --- path 1b: contiguous -> full-feature copy with static slice -----------
    def run_slice_copy():
        tile_r = _clamp_tile_r(budget // (2 * (feat + k) * itemsize), rows, sub, 4096)
        kernel = functools.partial(_slice_copy_kernel, start=start, k=k)
        return pl.pallas_call(
            kernel,
            out_shape=jax.ShapeDtypeStruct((rows, k), x.dtype),
            grid_spec=pltpu.PrefetchScalarGridSpec(
                num_scalar_prefetch=0,
                grid=(pl.cdiv(rows, tile_r),),
                in_specs=[pl.BlockSpec((tile_r, feat), lambda i: (i, 0))],
                out_specs=pl.BlockSpec((tile_r, k), lambda i: (i, 0)),
            ),
            compiler_params=params_1d(),
        )(x2)

    # --- path 2: one-hot MXU matmul over the active feature blocks ------------
    def run_mxu():
        slot = {int(b): s for s, b in enumerate(active_blocks)}
        sel_np = np.zeros((n_active * cb, k), dtype=np.float32)
        sel_rows = np.array([slot[int(v) // cb] * cb + int(v) % cb for v in idx],
                            dtype=np.int64)
        sel_np[sel_rows, np.arange(k)] = 1.0
        sel = jnp.asarray(sel_np, dtype=x.dtype)          # 0/1 is exact in bf16 too
        tbl = jnp.asarray(active_blocks.astype(np.int32))

        tile_r, tile_k = _mxu_tiles(k, cb, itemsize, budget, rows, sub)
        return pl.pallas_call(
            _onehot_matmul_kernel,
            out_shape=jax.ShapeDtypeStruct((rows, k), x.dtype),
            grid_spec=pltpu.PrefetchScalarGridSpec(
                num_scalar_prefetch=1,                    # active-block table -> SMEM
                grid=(pl.cdiv(rows, tile_r), pl.cdiv(k, tile_k), n_active),
                in_specs=[
                    pl.BlockSpec((tile_r, cb), lambda i, j, c, t: (i, t[c])),
                    pl.BlockSpec((cb, tile_k), lambda i, j, c, t: (c, j)),
                ],
                out_specs=pl.BlockSpec((tile_r, tile_k), lambda i, j, c, t: (i, j)),
                scratch_shapes=[pltpu.VMEM((tile_r, tile_k), jnp.float32)],
            ),
            compiler_params=pltpu.CompilerParams(
                dimension_semantics=("parallel", "parallel", "arbitrary"),
                vmem_limit_bytes=vmem_limit),
        )(tbl, x2, sel)

    # --- path 3: exact coalesced-run gather (non-float / opt-out dtypes) ------
    def run_gather():
        tile_r = _clamp_tile_r(budget // (2 * (feat + k) * itemsize), rows, sub, 512)
        kernel = functools.partial(_run_gather_kernel, runs=_coalesce_runs(idx))
        return pl.pallas_call(
            kernel,
            out_shape=jax.ShapeDtypeStruct((rows, k), x.dtype),
            grid_spec=pltpu.PrefetchScalarGridSpec(
                num_scalar_prefetch=0,
                grid=(pl.cdiv(rows, tile_r),),
                in_specs=[pl.BlockSpec((tile_r, feat), lambda i: (i, 0))],
                out_specs=pl.BlockSpec((tile_r, k), lambda i: (i, 0)),
            ),
            compiler_params=params_1d(),
        )(x2)

    if contiguous:
        if feat % 128 == 0 and start % 128 == 0 and n_active * 128 < feat:
            out2 = run_windowed_copy()
        elif use_mxu_dtype and cb == 128 and 2 * n_active * 128 <= feat:
            out2 = run_mxu()          # narrow unaligned window: big traffic saving
        else:
            out2 = run_slice_copy()
    elif use_mxu_dtype:
        out2 = run_mxu()
    else:
        # TODO(synk): int8/int16 could also ride the MXU path (values exact in
        # f32); kept on the exact gather path to minimise dtype-cast paths.
        out2 = run_gather()

    return out2.reshape(*lead, k)


# ---------------------------------------------------------------------------
# demo / correctness check
# ---------------------------------------------------------------------------
if __name__ == "__main__":
    ks = jax.random.split(jax.random.PRNGKey(0), 5)
    x = jax.random.normal(ks[0], (2, 4, 16, 16), dtype=jnp.float32)
    x_odd = jax.random.normal(ks[1], (3, 5, 16), dtype=jnp.float32)
    x_bf = jax.random.normal(ks[2], (2, 8, 384), dtype=jnp.bfloat16)
    x_al = jax.random.normal(ks[3], (4, 384), dtype=jnp.float32)
    x_int = jax.random.randint(ks[4], (2, 8, 64), 0, 1000, dtype=jnp.int32)

    cases = [
        (x, [0, 3, 5, 7, 12]),      # scattered float          -> one-hot MXU
        (x, slice(2, 14, 3)),       # strided slice            -> one-hot MXU
        (x, slice(2, 14)),          # contiguous, unaligned    -> full-feat copy
        (x, 7),                     # single index (K=1)       -> full-feat copy
        (x_odd, [1, -1, 4]),        # ragged rows + negative   -> one-hot MXU
        (x_bf, [3, 300, 7, 301]),   # bf16, 2 of 3 col blocks  -> active-block MXU
        (x_al, slice(128, 200)),    # 128-aligned contiguous   -> windowed block copy
        (x_int, [5, 1, 2, 3, 40]),  # int32, coalesced runs    -> exact gather
    ]

    for xi, indices in cases:
        out = select(xi, indices)
        jax.block_until_ready(out)

        idx = _normalize_indices(indices, xi.shape[-1])
        ref = jnp.take(xi, jnp.asarray(idx), axis=-1)
        assert out.shape == ref.shape, (out.shape, ref.shape)
        np.testing.assert_array_equal(np.asarray(out).astype(np.float64),
                                      np.asarray(ref).astype(np.float64))

    print("KERNEL_OK")
</pallas_src>

<mosaic_0001>
module attributes {stable_mosaic.version = 11 : i64} {
  func.func @_onehot_matmul_kernel(%arg0: i32, %arg1: i32, %arg2: i32, %arg3: memref<1xi32, #tpu.memory_space<smem>>, %arg4: memref<64x16xf32, #tpu.memory_space<vmem>>, %arg5: memref<16x5xf32, #tpu.memory_space<vmem>>, %arg6: memref<64x5xf32, #tpu.memory_space<vmem>>, %arg7: memref<64x5xf32, #tpu.memory_space<vmem>>) attributes {dimension_semantics = [#tpu.dimension_semantics<parallel>, #tpu.dimension_semantics<parallel>, #tpu.dimension_semantics<arbitrary>], iteration_bounds = array<i64: 2, 1, 1>, scalar_prefetch = 1 : i64, scratch_operands = 1 : i64, tpu.core_type = #tpu.core_type<tc>, window_params = [{transform_indices = @transform_0, window_bounds = array<i64: 64, 16>}, {transform_indices = @transform_1, window_bounds = array<i64: 16, 5>}, {transform_indices = @transform_2, window_bounds = array<i64: 64, 5>}]} {
    %c0_i32 = arith.constant 0 : i32
    %0 = arith.cmpi eq, %arg2, %c0_i32 : i32
    %1 = arith.extui %0 : i1 to i32
    %c0_i32_0 = arith.constant 0 : i32
    %2 = arith.cmpi ne, %1, %c0_i32_0 : i32
    scf.if %2 {
      %cst_10 = arith.constant 0.000000e+00 : f32
      %12 = vector.broadcast %cst_10 : f32 to vector<64x5xf32>
      %c0_11 = arith.constant 0 : index
      %c0_12 = arith.constant 0 : index
      %13 = vector.load %arg7[%c0_11, %c0_12] : memref<64x5xf32, #tpu.memory_space<vmem>>, vector<64x5xf32>
      tpu.vector_store %arg7[%c0_11, %c0_12], %12 {strides = array<i32>} : memref<64x5xf32, #tpu.memory_space<vmem>>, vector<64x5xf32>,
    } else {
    }
    %c0 = arith.constant 0 : index
    %c0_1 = arith.constant 0 : index
    %3 = vector.load %arg7[%c0, %c0_1] : memref<64x5xf32, #tpu.memory_space<vmem>>, vector<64x5xf32>
    %c0_2 = arith.constant 0 : index
    %c0_3 = arith.constant 0 : index
    %4 = vector.load %arg4[%c0_2, %c0_3] : memref<64x16xf32, #tpu.memory_space<vmem>>, vector<64x16xf32>
    %c0_4 = arith.constant 0 : index
    %c0_5 = arith.constant 0 : index
    %5 = vector.load %arg5[%c0_4, %c0_5] : memref<16x5xf32, #tpu.memory_space<vmem>>, vector<16x5xf32>
    %cst = arith.constant dense<0.000000e+00> : vector<64x5xf32>
    %6 = tpu.matmul %4, %5, %cst {dimension_numbers = #tpu.dot_dimension_numbers<[1], [0], [0], [1], [0, 0, 1, 1], [], []>} : vector<64x16xf32>, vector<16x5xf32>, vector<64x5xf32> -> vector<64x5xf32>
    %7 = arith.addf %3, %6 : vector<64x5xf32>
    %c0_6 = arith.constant 0 : index
    %c0_7 = arith.constant 0 : index
    %8 = vector.load %arg7[%c0_6, %c0_7] : memref<64x5xf32, #tpu.memory_space<vmem>>, vector<64x5xf32>
    tpu.vector_store %arg7[%c0_6, %c0_7], %7 {strides = array<i32>} : memref<64x5xf32, #tpu.memory_space<vmem>>, vector<64x5xf32>,
    %c0_i32_8 = arith.constant 0 : i32
    %9 = arith.cmpi eq, %arg2, %c0_i32_8 : i32
    %10 = arith.extui %9 : i1 to i32
    %c0_i32_9 = arith.constant 0 : i32
    %11 = arith.cmpi ne, %10, %c0_i32_9 : i32
    scf.if %11 {
      %c0_10 = arith.constant 0 : index
      %c0_11 = arith.constant 0 : index
      %12 = vector.load %arg7[%c0_10, %c0_11] : memref<64x5xf32, #tpu.memory_space<vmem>>, vector<64x5xf32>
      %c0_12 = arith.constant 0 : index
      %c0_13 = arith.constant 0 : index
      %13 = vector.load %arg6[%c0_12, %c0_13] : memref<64x5xf32, #tpu.memory_space<vmem>>, vector<64x5xf32>
      tpu.vector_store %arg6[%c0_12, %c0_13], %12 {strides = array<i32>} : memref<64x5xf32, #tpu.memory_space<vmem>>, vector<64x5xf32>,
    } else {
    }
    return
  }
  func.func @transform_0(%arg0: i32, %arg1: i32, %arg2: i32, %arg3: memref<1xi32, #tpu.memory_space<smem>>) -> (i32, i32) {
    %0 = arith.index_cast %arg2 : i32 to index
    %1 = memref.load %arg3[%0] : memref<1xi32, #tpu.memory_space<smem>>
    %c0_i32 = arith.constant 0 : i32
    return %arg0, %1 : i32, i32
  }
  func.func @transform_1(%arg0: i32, %arg1: i32, %arg2: i32, %arg3: memref<1xi32, #tpu.memory_space<smem>>) -> (i32, i32) {
    %c0_i32 = arith.constant 0 : i32
    return %arg2, %arg1 : i32, i32
  }
  func.func @transform_2(%arg0: i32, %arg1: i32, %arg2: i32, %arg3: memref<1xi32, #tpu.memory_space<smem>>) -> (i32, i32) {
    %c0_i32 = arith.constant 0 : i32
    return %arg0, %arg1 : i32, i32
  }
}

</mosaic_0001>

<bundles_post_ra>
// kernel: tpu_custom_call.1
= control target key start
LH: loop header
LB: loop body
LE: loop exit
PB: predicated region body
PF: predicated region fallthrough
CT: control target
= control target key end

     0   :  { %s648_s14 = smov 0   ;;  %s650_s15 = smov 0   ;;  %s732_s0 = inlined_call_operand.<no memory space> [shape: s32[1], index: 0, kind: input, shape index: {}]   ;;  %s733_s1 = inlined_call_operand.vmem [shape: f32[128,16], index: 1, kind: input, shape index: {}]   ;;  %s734_s2 = inlined_call_operand.vmem [shape: f32[16,5], index: 2, kind: input, shape index: {}]   ;;  %s735_s3 = inlined_call_operand.vmem [shape: f32[128,5], index: 3, kind: output, shape index: {}]  }
   0x1   :  { %8 = sst [smem:[#allocation4]] %s732_s0  ;;  %s652_s16 = smov 0  }
   0x2 LB: > { %s33_s0 = sadd.s32 1, %s618_s15  ;;  %p528_p0 = scmp.ge.s32.totalorder %s622_s16, 1  ;;  %s622_s16 = sphi %s652_s16, %s14_s16   ;;  %s618_s15 = sphi %s650_s15, %s738_s15   ;;  %s614_s14 = sphi %s648_s14, %s737_s14  }
   0x3   : > { %p35_p1 = scmp.ge.s32.totalorder %s33_s0, 2  ;;  %p161_p2 = scmp.lt.s32.totalorder %s622_s16, 3 }
   0x5   : > { %s740_s0 = smov (%p35_p1, %s33_s0), 0  ;;  %p162_p3 = pnand %p528_p0, %p161_p2 }
   0x6   : > { %v256_v0 = vld [vmem:[%s734_s2] sm:$0xff] (!%p162_p3)  ;;  %v257_v1 = vld [vmem:[%s734_s2 + $0x8] sm:$0xff] (!%p162_p3)  ;;  %s198_s21 = sld [smem:[#allocation4]] (!%p162_p3)  ;;  %s529_s22 = sshll.u32 (!%p162_p3), %s614_s14, 3  ;;  %vm231_vm0 = vcmask (!%p162_p3), 39936   ;;  %v624_v3 = vmov (!%p162_p3), 0.0  }
   0x7   : > { %165 = sbr.rel (%p162_p3) target bundleno = 249 (0xf9), region = 28  ;;  %v569_v2 = vpack.c.bf16 (!%p162_p3), %v257_v1, %v256_v0  ;;  %p675_p4 = scmp.lt.s32.totalorder (!%p162_p3), %s529_s22, 15  ;;  %233 = vst.msk [vmem:[#allocation2 + $0x8] sm:$0xff] (!%p162_p3), %vm231_vm0, %v624_v3  ;;  %232 = vst.msk [vmem:[#allocation2] sm:$0xff] (!%p162_p3), %vm231_vm0, %v624_v3  ;;  %vm258_vm1 = vcmask (!%p162_p3), 130048  }
   0x8   : > { %234 = vst.msk [vmem:[#allocation2 + $0x10] sm:$0xff] (!%p162_p3), %vm231_vm0, %v624_v3  ;;  %235 = vst.msk [vmem:[#allocation2 + $0x18] sm:$0xff] (!%p162_p3), %vm231_vm0, %v624_v3 }
   0x9   : > { %236 = vst.msk [vmem:[#allocation2 + $0x20] sm:$0xff] (!%p162_p3), %vm231_vm0, %v624_v3  ;;  %237 = vst.msk [vmem:[#allocation2 + $0x28] sm:$0xff] (!%p162_p3), %vm231_vm0, %v624_v3  ;;  %570 = vmatprep.subr.bf16.mxu0 (!%p162_p3), %v569_v2  ;;  %573 = vmatprep.subr.bf16.mxu1 (!%p162_p3), %v569_v2 }
   0xa   : > { %238 = vst.msk [vmem:[#allocation2 + $0x30] sm:$0xff] (!%p162_p3), %vm231_vm0, %v624_v3  ;;  %239 = vst.msk [vmem:[#allocation2 + $0x38] sm:$0xff] (!%p162_p3), %vm231_vm0, %v624_v3  ;;  %572 = vmatpush3.bf16.msra.mxu0 (!%p162_p3), %v569_v2  ;;  %574 = vmatpush3.bf16.msra.mxu1 (!%p162_p3), %v569_v2 }
   0xc   : > { %p202_p5 = scmp.lt.s32.totalorder (!%p162_p3), %s198_s21, 0 }
   0xe   : > { %s742_s22 = smov (!%p675_p4, %s529_s22), 15  ;;  %s744_s21 = smov (!%p202_p5, %s198_s21), 0  ;;  %v241_v12 = vld [vmem:[#allocation2 + $0x8] sm:$0xff]  ;;  %v240_v14 = vld [vmem:[#allocation2] sm:$0xff] }
   0xf   : > { %s204_s24 = sadd.s32 %s744_s21, %s742_s22  ;;  %v243_v24 = vld [vmem:[#allocation2 + $0x18] sm:$0xff]  ;;  %v242_v26 = vld [vmem:[#allocation2 + $0x10] sm:$0xff]  ;;  %s532_s29 = sshll.u32 %s742_s22, 3 }
  0x10   : > { %s530_s25 = sshll.u32 %s204_s24, 3  ;;  %v245_v13 = vld [vmem:[#allocation2 + $0x28] sm:$0xff]  ;;  %v244_v15 = vld [vmem:[#allocation2 + $0x20] sm:$0xff]  ;;  %s225_s5 = scalar_lea.vmem %s735_s3, %s532_s29 }
  0x11   : > { %s206_s28 = scalar_lea.vmem %s733_s1, %s530_s25  ;;  %v247_v25 = vld [vmem:[#allocation2 + $0x38] sm:$0xff]  ;;  %v246_v27 = vld [vmem:[#allocation2 + $0x30] sm:$0xff] }
  0x12   : > { %v248_v4 = vld [vmem:[%s206_s28] sm:$0xff]  ;;  %v249_v6 = vld [vmem:[%s206_s28 + $0x8] sm:$0xff]  ;;  %v250_v8 = vld [vmem:[%s206_s28 + $0x10] sm:$0xff] }
  0x13   : > { %v252_v5 = vld [vmem:[%s206_s28 + $0x20] sm:$0xff]  ;;  %557 = vmatprep.mubr.msk.f32.mxu0 %vm258_vm1, %v248_v4  ;;  %v253_v7 = vld [vmem:[%s206_s28 + $0x28] sm:$0xff]  ;;  %v254_v9 = vld [vmem:[%s206_s28 + $0x30] sm:$0xff] }
  0x14   : > { %563 = vmatprep.mubr.msk.f32.mxu1 %vm258_vm1, %v252_v5  ;;  %558 = vmatmul.mubr.msk.f32.vlgmr.msra.gmra.mrb[0].mxu0 %vm258_vm1, %v249_v6  ;;  %v251_v10 = vld [vmem:[%s206_s28 + $0x18] sm:$0xff] }
  0x15   : > { %564 = vmatmul.mubr.msk.f32.vlgmr.msra.gmra.mrb[0].mxu1 %vm258_vm1, %v253_v7  ;;  %560 = vmatprep.mubr.msk.f32.mxu0 %vm258_vm1, %v250_v8  ;;  %v255_v11 = vld [vmem:[%s206_s28 + $0x38] sm:$0xff] }
  0x16   : > { %566 = vmatprep.mubr.msk.f32.mxu1 %vm258_vm1, %v254_v9 }
  0x18   : > { %561 = vmatmul.mubr.msk.f32.gmra.mrb[2].mxu0 %vm258_vm1, %v251_v10 }
  0x19   : > { %567 = vmatmul.mubr.msk.f32.gmra.mrb[2].mxu1 %vm258_vm1, %v255_v11 }
  0xe7   : > { %v559_v16 = vpop.f32.mrb[0].mxu0 }
  0xe8   : > { %v565_v17 = vpop.f32.mrb[0].mxu1  ;;  %v389_v18 = vadd.f32 %v559_v16, %v241_v12  ;;  %v349_v20 = vpop.f32.mrb[1].mxu0 }
  0xe9   : > { %v393_v19 = vadd.f32 %v565_v17, %v245_v13  ;;  %v369_v21 = vpop.f32.mrb[1].mxu1  ;;  %v388_v22 = vadd.f32 %v349_v20, %v240_v14 }
  0xea   : > { %v392_v23 = vadd.f32 %v369_v21, %v244_v15  ;;  %398 = vst.msk [vmem:[#allocation2 + $0x8] sm:$0xff] %vm231_vm0, %v389_v18 }
  0xeb   : > { %402 = vst.msk [vmem:[#allocation2 + $0x28] sm:$0xff] %vm231_vm0, %v393_v19  ;;  %397 = vst.msk [vmem:[#allocation2] sm:$0xff] %vm231_vm0, %v388_v22  ;;  %v562_v28 = vpop.f32.mrb[2].mxu0 }
  0xec   : > { %401 = vst.msk [vmem:[#allocation2 + $0x20] sm:$0xff] %vm231_vm0, %v392_v23  ;;  %v568_v29 = vpop.f32.mrb[2].mxu1  ;;  %v391_v30 = vadd.f32 %v562_v28, %v243_v24  ;;  %v359_v32 = vpop.f32.mrb[3].mxu0 }
  0xed   : > { %v395_v31 = vadd.f32 %v568_v29, %v247_v25  ;;  %v379_v33 = vpop.f32.mrb[3].mxu1  ;;  %v390_v34 = vadd.f32 %v359_v32, %v242_v26 }
  0xee   : > { %v394_v35 = vadd.f32 %v379_v33, %v246_v27  ;;  %400 = vst.msk [vmem:[#allocation2 + $0x18] sm:$0xff] %vm231_vm0, %v391_v30 }
  0xef   : > { %404 = vst.msk [vmem:[#allocation2 + $0x38] sm:$0xff] %vm231_vm0, %v395_v31  ;;  %399 = vst.msk [vmem:[#allocation2 + $0x10] sm:$0xff] %vm231_vm0, %v390_v34 }
  0xf0   : > { %403 = vst.msk [vmem:[#allocation2 + $0x30] sm:$0xff] %vm231_vm0, %v394_v35 }
  0xf1   : > { %v409_v36 = vld [vmem:[#allocation2 + $0x8] sm:$0xff] }
  0xf2   : > { %v413_v37 = vld [vmem:[#allocation2 + $0x28] sm:$0xff]  ;;  %417 = vst.msk [vmem:[%s225_s5 + $0x8] sm:$0xff] %vm231_vm0, %v409_v36  ;;  %v408_v38 = vld [vmem:[#allocation2] sm:$0xff] }
  0xf3   : > { %421 = vst.msk [vmem:[%s225_s5 + $0x28] sm:$0xff] %vm231_vm0, %v413_v37  ;;  %v412_v39 = vld [vmem:[#allocation2 + $0x20] sm:$0xff]  ;;  %416 = vst.msk [vmem:[%s225_s5] sm:$0xff] %vm231_vm0, %v408_v38 }
  0xf4   : > { %420 = vst.msk [vmem:[%s225_s5 + $0x20] sm:$0xff] %vm231_vm0, %v412_v39 }
  0xf5   : > { %v411_v40 = vld [vmem:[#allocation2 + $0x18] sm:$0xff] }
  0xf6   : > { %v415_v41 = vld [vmem:[#allocation2 + $0x38] sm:$0xff]  ;;  %419 = vst.msk [vmem:[%s225_s5 + $0x18] sm:$0xff] %vm231_vm0, %v411_v40  ;;  %v410_v42 = vld [vmem:[#allocation2 + $0x10] sm:$0xff] }
  0xf7   : > { %423 = vst.msk [vmem:[%s225_s5 + $0x38] sm:$0xff] %vm231_vm0, %v415_v41  ;;  %v414_v43 = vld [vmem:[#allocation2 + $0x30] sm:$0xff]  ;;  %418 = vst.msk [vmem:[%s225_s5 + $0x10] sm:$0xff] %vm231_vm0, %v410_v42 }
  0xf8   : > { %422 = vst.msk [vmem:[%s225_s5 + $0x30] sm:$0xff] %vm231_vm0, %v414_v43 }
  0xf9 PF: > { %s14_s16 = sadd.s32 1, %s622_s16   ;;  %s737_s14 = smov %s618_s15 }
  0xfa   : > { %p11_p6 = scmp.ge.s32.totalorder %s14_s16, 4   ;;  %s738_s15 = smov %s740_s0 }
  0xfc   :  { %13 = sbr.rel (!%p11_p6) target bundleno = 2 (0x2), region = 69 }

</bundles_post_ra>
